<compile_context>
chip_gen: v7x
topology: tpu7x:2x2x1
jax: 0.10.0
libtpu: 0.0.40
codegen_flags: <defaults>
</compile_context>

<pallas_src>
import functools

import jax
import jax.numpy as jnp
from jax.experimental import pallas as pl
from jax.experimental.pallas import tpu as pltpu

LN_EPS = 1e-5      # nn.LayerNorm default
VN_EPS = 1e-8      # _norm_no_nan default

_VMEM_LIMIT_BYTES = 32 * 1024 * 1024   # explicit scoped-VMEM limit (all gens)
_VMEM_PIPE_BUDGET = 20 * 1024 * 1024   # budget for double-buffered in+out tiles


def _round_up(x, m):
    return ((x + m - 1) // m) * m


def _sublane_multiple(dtype):
    # f32 -> 8, bf16 -> 16, int8/fp8 -> 32 (sub-32-bit packs along sublanes).
    return max(8, 32 // jnp.dtype(dtype).itemsize)


def _pick_block_n(n, s_width, v_width, dtype, *, target=1024):
    """Rows per grid step: VMEM-budget capped, >= ~8 grid steps for large N."""
    sub = _sublane_multiple(dtype)
    itemsize = jnp.dtype(dtype).itemsize
    # Lane-padded VMEM bytes per row, double-buffered, inputs + outputs.
    padded = _round_up(s_width, 128) + _round_up(v_width, 128)
    per_row = 4 * padded * itemsize
    by_vmem = max(sub, (_VMEM_PIPE_BUDGET // max(per_row, 1)) // sub * sub)
    # Keep >= ~8 grid steps when N is large so both v7x TensorCores get
    # several pipeline stages each (dimension_semantics=("parallel",)).
    by_steps = _round_up(pl.cdiv(n, 8), sub)
    block = min(target, by_steps, by_vmem)
    block = min(block, _round_up(n, sub))   # never bigger than the padded array
    return max(sub, block)


def _gvp_layernorm_kernel(s_ref, v_ref, w_ref, b_ref, s_out_ref, v_out_ref, *,
                          n_vec):
    # ---- scalar channel LayerNorm over the last axis ----
    s = s_ref[...].astype(jnp.float32)                              # (bn, S)
    mean = jnp.mean(s, axis=-1, keepdims=True)
    centered = s - mean
    var = jnp.mean(centered * centered, axis=-1, keepdims=True)
    s_hat = centered * jax.lax.rsqrt(var + LN_EPS)
    s_out_ref[...] = (s_hat * w_ref[...] + b_ref[...]).astype(s_out_ref.dtype)

    # ---- vector channel norm ----
    # v_ref layout: (bn, 3V) AoS = [x_0, y_0, z_0, x_1, y_1, z_1, ...]
    v = v_ref[...].astype(jnp.float32)                              # (bn, 3V)
    v2 = v * v
    # Per-channel sum of squares via a tiny 0/1 selection matmul:
    #   sel[3i+c, i] = 1  ->  ssq[:, i] = v2[:, 3i] + v2[:, 3i+1] + v2[:, 3i+2]
    # MXU is idle in this kernel, so this is free filler under the DMA stream
    # and avoids any relayout / transpose of the interleaved data.
    r = jax.lax.broadcasted_iota(jnp.int32, (3 * n_vec, n_vec), 0)
    c = jax.lax.broadcasted_iota(jnp.int32, (3 * n_vec, n_vec), 1)
    sel = ((r == 3 * c) | (r == 3 * c + 1) | (r == 3 * c + 2)).astype(jnp.float32)
    ssq = jnp.dot(v2, sel, preferred_element_type=jnp.float32)      # (bn, V)
    ssq = jnp.maximum(ssq, VN_EPS)                                  # clamp(min=eps)
    inv_vn = jax.lax.rsqrt(jnp.mean(ssq, axis=-1, keepdims=True))   # (bn, 1)
    v_out_ref[...] = (v * inv_vn).astype(v_out_ref.dtype)


def gvp_layernorm(s, v, weight, bias, *, block_n=None):
    """Combined (s, V) LayerNorm. s:(N, S), v:(N, V, 3) -> same shapes."""
    N, S = s.shape
    Nv, V, C = v.shape
    assert C == 3 and Nv == N

    # (N, V, 3) -> (N, 3V): collapses the two minor dims of a row-major
    # buffer, so it is a bitcast (no HBM copy), unlike a transpose.
    v_flat = v.reshape(N, 3 * V)

    if block_n is None:
        block_n = _pick_block_n(N, S, 3 * V, s.dtype)
    sub = _sublane_multiple(s.dtype)
    block_n = max(sub, _round_up(block_n, sub))

    w2 = weight.reshape(1, S).astype(jnp.float32)
    b2 = bias.reshape(1, S).astype(jnp.float32)

    grid = (pl.cdiv(N, block_n),)   # last block may be partial; rows independent
    kernel = functools.partial(_gvp_layernorm_kernel, n_vec=V)

    s_out, v_out = pl.pallas_call(
        kernel,
        out_shape=(
            jax.ShapeDtypeStruct((N, S), s.dtype),
            jax.ShapeDtypeStruct((N, 3 * V), v.dtype),
        ),
        grid_spec=pltpu.PrefetchScalarGridSpec(
            num_scalar_prefetch=0,
            grid=grid,
            in_specs=[
                pl.BlockSpec((block_n, S), lambda i: (i, 0)),
                pl.BlockSpec((block_n, 3 * V), lambda i: (i, 0)),
                pl.BlockSpec((1, S), lambda i: (0, 0)),
                pl.BlockSpec((1, S), lambda i: (0, 0)),
            ],
            out_specs=[
                pl.BlockSpec((block_n, S), lambda i: (i, 0)),
                pl.BlockSpec((block_n, 3 * V), lambda i: (i, 0)),
            ],
        ),
        compiler_params=pltpu.CompilerParams(
            dimension_semantics=("parallel",),
            vmem_limit_bytes=_VMEM_LIMIT_BYTES,
        ),
    )(s, v_flat, w2, b2)

    # (N, 3V) -> (N, V, 3): again a bitcast, no HBM copy.
    return s_out, v_out.reshape(N, V, 3)


def _reference(s, v, weight, bias):
    s = s.astype(jnp.float32)
    mean = jnp.mean(s, axis=-1, keepdims=True)
    var = jnp.mean(jnp.square(s - mean), axis=-1, keepdims=True)
    s_out = (s - mean) / jnp.sqrt(var + LN_EPS) * weight + bias
    vn = jnp.clip(jnp.sum(jnp.square(v), axis=-1, keepdims=True), VN_EPS, None)
    vn = jnp.sqrt(jnp.mean(vn, axis=-2, keepdims=True))
    return s_out, v / vn


if __name__ == "__main__":
    # dims = (S, V) for the GVP LayerNorm
    N, S, V = 8, 32, 16

    key = jax.random.PRNGKey(0)
    k_s, k_v, k_w, k_b = jax.random.split(key, 4)
    s = jax.random.normal(k_s, (N, S), dtype=jnp.float32)
    v = jax.random.normal(k_v, (N, V, 3), dtype=jnp.float32)
    # PyTorch defaults are ones/zeros; randomized here for a nontrivial
    # (still deterministic) affine check.
    weight = 1.0 + 0.1 * jax.random.normal(k_w, (S,), dtype=jnp.float32)
    bias = 0.1 * jax.random.normal(k_b, (S,), dtype=jnp.float32)

    s_out, v_out = gvp_layernorm(s, v, weight, bias)
    jax.block_until_ready((s_out, v_out))

    s_ref, v_ref = _reference(s, v, weight, bias)
    assert jnp.allclose(s_out, s_ref, atol=1e-5, rtol=1e-5)
    assert jnp.allclose(v_out, v_ref, atol=1e-5, rtol=1e-5)
    print("KERNEL_OK")
</pallas_src>

<mosaic_0001>
module attributes {stable_mosaic.version = 11 : i64} {
  func.func @_gvp_layernorm_kernel(%arg0: i32, %arg1: memref<8x32xf32, #tpu.memory_space<vmem>>, %arg2: memref<8x48xf32, #tpu.memory_space<vmem>>, %arg3: memref<1x32xf32, #tpu.memory_space<vmem>>, %arg4: memref<1x32xf32, #tpu.memory_space<vmem>>, %arg5: memref<8x32xf32, #tpu.memory_space<vmem>>, %arg6: memref<8x48xf32, #tpu.memory_space<vmem>>) attributes {dimension_semantics = [#tpu.dimension_semantics<parallel>], iteration_bounds = array<i64: 1>, scalar_prefetch = 0 : i64, scratch_operands = 0 : i64, tpu.core_type = #tpu.core_type<tc>, window_params = [{transform_indices = @transform_0, window_bounds = array<i64: 8, 32>}, {transform_indices = @transform_1, window_bounds = array<i64: 8, 48>}, {pipeline_mode = #tpu.pipeline_mode<synchronous>, transform_indices = @transform_2, window_bounds = array<i64: 1, 32>}, {pipeline_mode = #tpu.pipeline_mode<synchronous>, transform_indices = @transform_3, window_bounds = array<i64: 1, 32>}, {transform_indices = @transform_4, window_bounds = array<i64: 8, 32>}, {transform_indices = @transform_5, window_bounds = array<i64: 8, 48>}]} {
    %c0 = arith.constant 0 : index
    %c0_0 = arith.constant 0 : index
    %0 = vector.load %arg1[%c0, %c0_0] : memref<8x32xf32, #tpu.memory_space<vmem>>, vector<8x32xf32>
    %cst = arith.constant dense<0.000000e+00> : vector<8xf32>
    %1 = vector.multi_reduction <add>, %0, %cst [1] : vector<8x32xf32> to vector<8xf32>
    %2 = vector.shape_cast %1 : vector<8xf32> to vector<8x1xf32>
    %cst_1 = arith.constant 3.200000e+01 : f32
    %3 = vector.broadcast %cst_1 : f32 to vector<8x1xf32>
    %4 = arith.divf %2, %3 : vector<8x1xf32>
    %5 = vector.broadcast %4 : vector<8x1xf32> to vector<8x32xf32>
    %6 = arith.subf %0, %5 : vector<8x32xf32>
    %7 = arith.mulf %6, %6 : vector<8x32xf32>
    %cst_2 = arith.constant dense<0.000000e+00> : vector<8xf32>
    %8 = vector.multi_reduction <add>, %7, %cst_2 [1] : vector<8x32xf32> to vector<8xf32>
    %9 = vector.shape_cast %8 : vector<8xf32> to vector<8x1xf32>
    %cst_3 = arith.constant 3.200000e+01 : f32
    %10 = vector.broadcast %cst_3 : f32 to vector<8x1xf32>
    %11 = arith.divf %9, %10 : vector<8x1xf32>
    %cst_4 = arith.constant 9.99999974E-6 : f32
    %12 = vector.broadcast %cst_4 : f32 to vector<8x1xf32>
    %13 = arith.addf %11, %12 : vector<8x1xf32>
    %14 = math.rsqrt %13 : vector<8x1xf32>
    %15 = vector.broadcast %14 : vector<8x1xf32> to vector<8x32xf32>
    %16 = arith.mulf %6, %15 : vector<8x32xf32>
    %c0_5 = arith.constant 0 : index
    %c0_6 = arith.constant 0 : index
    %17 = vector.load %arg3[%c0_5, %c0_6] : memref<1x32xf32, #tpu.memory_space<vmem>>, vector<1x32xf32>
    %18 = vector.broadcast %17 : vector<1x32xf32> to vector<8x32xf32>
    %19 = arith.mulf %16, %18 : vector<8x32xf32>
    %c0_7 = arith.constant 0 : index
    %c0_8 = arith.constant 0 : index
    %20 = vector.load %arg4[%c0_7, %c0_8] : memref<1x32xf32, #tpu.memory_space<vmem>>, vector<1x32xf32>
    %21 = vector.broadcast %20 : vector<1x32xf32> to vector<8x32xf32>
    %22 = arith.addf %19, %21 : vector<8x32xf32>
    %c0_9 = arith.constant 0 : index
    %c0_10 = arith.constant 0 : index
    %23 = vector.load %arg5[%c0_9, %c0_10] : memref<8x32xf32, #tpu.memory_space<vmem>>, vector<8x32xf32>
    tpu.vector_store %arg5[%c0_9, %c0_10], %22 {strides = array<i32>} : memref<8x32xf32, #tpu.memory_space<vmem>>, vector<8x32xf32>,
    %c0_11 = arith.constant 0 : index
    %c0_12 = arith.constant 0 : index
    %24 = vector.load %arg2[%c0_11, %c0_12] : memref<8x48xf32, #tpu.memory_space<vmem>>, vector<8x48xf32>
    %25 = arith.mulf %24, %24 : vector<8x48xf32>
    %26 = tpu.iota {dimensions = array<i32: 0>} : vector<48x16xi32>
    %27 = tpu.iota {dimensions = array<i32: 1>} : vector<48x16xi32>
    %c3_i32 = arith.constant 3 : i32
    %28 = vector.broadcast %c3_i32 : i32 to vector<48x16xi32>
    %29 = arith.muli %28, %27 : vector<48x16xi32>
    %30 = arith.cmpi eq, %26, %29 : vector<48x16xi32>
    %c3_i32_13 = arith.constant 3 : i32
    %31 = vector.broadcast %c3_i32_13 : i32 to vector<48x16xi32>
    %32 = arith.muli %31, %27 : vector<48x16xi32>
    %c1_i32 = arith.constant 1 : i32
    %33 = vector.broadcast %c1_i32 : i32 to vector<48x16xi32>
    %34 = arith.addi %32, %33 : vector<48x16xi32>
    %35 = arith.cmpi eq, %26, %34 : vector<48x16xi32>
    %36 = arith.ori %30, %35 : vector<48x16xi1>
    %c3_i32_14 = arith.constant 3 : i32
    %37 = vector.broadcast %c3_i32_14 : i32 to vector<48x16xi32>
    %38 = arith.muli %37, %27 : vector<48x16xi32>
    %c2_i32 = arith.constant 2 : i32
    %39 = vector.broadcast %c2_i32 : i32 to vector<48x16xi32>
    %40 = arith.addi %38, %39 : vector<48x16xi32>
    %41 = arith.cmpi eq, %26, %40 : vector<48x16xi32>
    %42 = arith.ori %36, %41 : vector<48x16xi1>
    %43 = arith.extui %42 : vector<48x16xi1> to vector<48x16xi32>
    %44 = arith.sitofp %43 : vector<48x16xi32> to vector<48x16xf32>
    %cst_15 = arith.constant dense<0.000000e+00> : vector<8x16xf32>
    %45 = tpu.matmul %25, %44, %cst_15 {dimension_numbers = #tpu.dot_dimension_numbers<[1], [0], [0], [1], [0, 0, 1, 1], [], []>} : vector<8x48xf32>, vector<48x16xf32>, vector<8x16xf32> -> vector<8x16xf32>
    %cst_16 = arith.constant 9.99999993E-9 : f32
    %46 = vector.broadcast %cst_16 : f32 to vector<8x16xf32>
    %47 = arith.maximumf %45, %46 : vector<8x16xf32>
    %cst_17 = arith.constant dense<0.000000e+00> : vector<8xf32>
    %48 = vector.multi_reduction <add>, %47, %cst_17 [1] : vector<8x16xf32> to vector<8xf32>
    %49 = vector.shape_cast %48 : vector<8xf32> to vector<8x1xf32>
    %cst_18 = arith.constant 1.600000e+01 : f32
    %50 = vector.broadcast %cst_18 : f32 to vector<8x1xf32>
    %51 = arith.divf %49, %50 : vector<8x1xf32>
    %52 = math.rsqrt %51 : vector<8x1xf32>
    %53 = vector.broadcast %52 : vector<8x1xf32> to vector<8x48xf32>
    %54 = arith.mulf %24, %53 : vector<8x48xf32>
    %c0_19 = arith.constant 0 : index
    %c0_20 = arith.constant 0 : index
    %55 = vector.load %arg6[%c0_19, %c0_20] : memref<8x48xf32, #tpu.memory_space<vmem>>, vector<8x48xf32>
    tpu.vector_store %arg6[%c0_19, %c0_20], %54 {strides = array<i32>} : memref<8x48xf32, #tpu.memory_space<vmem>>, vector<8x48xf32>,
    return
  }
  func.func @transform_0(%arg0: i32) -> (i32, i32) {
    %c0_i32 = arith.constant 0 : i32
    %c0_i32_0 = arith.constant 0 : i32
    return %arg0, %c0_i32 : i32, i32
  }
  func.func @transform_1(%arg0: i32) -> (i32, i32) {
    %c0_i32 = arith.constant 0 : i32
    %c0_i32_0 = arith.constant 0 : i32
    return %arg0, %c0_i32 : i32, i32
  }
  func.func @transform_2(%arg0: i32) -> (i32, i32) {
    %c0_i32 = arith.constant 0 : i32
    %c0_i32_0 = arith.constant 0 : i32
    %c0_i32_1 = arith.constant 0 : i32
    return %c0_i32, %c0_i32_0 : i32, i32
  }
  func.func @transform_3(%arg0: i32) -> (i32, i32) {
    %c0_i32 = arith.constant 0 : i32
    %c0_i32_0 = arith.constant 0 : i32
    %c0_i32_1 = arith.constant 0 : i32
    return %c0_i32, %c0_i32_0 : i32, i32
  }
  func.func @transform_4(%arg0: i32) -> (i32, i32) {
    %c0_i32 = arith.constant 0 : i32
    %c0_i32_0 = arith.constant 0 : i32
    return %arg0, %c0_i32 : i32, i32
  }
  func.func @transform_5(%arg0: i32) -> (i32, i32) {
    %c0_i32 = arith.constant 0 : i32
    %c0_i32_0 = arith.constant 0 : i32
    return %arg0, %c0_i32 : i32, i32
  }
}

</mosaic_0001>

<bundles_post_ra>
// kernel: tpu_custom_call.1
= control target key start
LH: loop header
LB: loop body
LE: loop exit
PB: predicated region body
PF: predicated region fallthrough
CT: control target
= control target key end

     0   :  { %11 = vsyncpa [#allocation3], 0  ;;  %s499_s0 = inlined_call_operand.hbm [shape: f32[8,32], index: 0, kind: input, shape index: {}]   ;;  %s500_s1 = inlined_call_operand.hbm [shape: f32[8,48], index: 1, kind: input, shape index: {}]   ;;  %s501_s2 = inlined_call_operand.vmem [shape: f32[1,32], index: 2, kind: input, shape index: {}]   ;;  %s502_s3 = inlined_call_operand.vmem [shape: f32[1,32], index: 3, kind: input, shape index: {}]   ;;  %s503_s4 = inlined_call_operand.hbm [shape: f32[8,32], index: 4, kind: output, shape index: {0}]   ;;  %s504_s5 = inlined_call_operand.hbm [shape: f32[8,48], index: 5, kind: output, shape index: {1}]  }
   0x1   :  { %12 = vsyncpa [#allocation6], 0 }
   0x2   :  { %13 = vsyncpa [#allocation4], 0 }
   0x3   :  { %14 = vsyncpa [#allocation9], 0  ;;  %s402_s18 = smov [#allocation2]   ;;  %s403_s20 = smov [#allocation5]  }
   0x4   :  { %s21_s19 = sshll.u32 %s402_s18, 4  ;;  %s31_s21 = sshll.u32 %s403_s20, 4  ;;  %s22_s19 = int_to_ptr.vmem [resolvable:$true] %s21_s19  ;;  %s32_s21 = int_to_ptr.vmem [resolvable:$true] %s31_s21 }
   0x5   :  { %s306_s24 = scalar_lea.hbm %s499_s0, 128 }
   0x6   :  { %p307_p0 = scmp.ne.s32.totalorder %s499_s0, %s306_s24  ;;  %p310_p1 = scmp.lt.u32.totalorder %s306_s24, %s499_s0 }
   0x8   :  { %p312_p2 = pnand %p310_p1, %p307_p0 }
   0xa   :  { %315 = shalt.err (!%p312_p2)
}
   0xb   :  { %s316_s29 = scalar_lea.vmem %s22_s19, 128  ;;  %p321_p4 = scmp.lt.s32.totalorder %s22_s19, %s22_s19 }
   0xc   :  { %p317_p3 = scmp.ne.s32.totalorder %s22_s19, %s316_s29  ;;  %p322_p5 = scmp.lt.s32.totalorder %s316_s29, %s316_s29 }
   0xe   :  { %p323_p6 = por %p322_p5, %p321_p4 }
  0x10   :  { %p324_p7 = pnand %p323_p6, %p317_p3 }
  0x12   :  { %327 = shalt.err (!%p324_p7)
}
  0x13   :  { %24 = dma.hbm_to_vmem [thread:$0]  %s499_s0, 128, %s22_s19, [#allocation3]  }
  0x14   :  { %s328_s9 = scalar_lea.hbm %s500_s1, 128 }
  0x15   :  { %p329_p8 = scmp.ne.s32.totalorder %s500_s1, %s328_s9  ;;  %p332_p9 = scmp.lt.u32.totalorder %s328_s9, %s500_s1 }
  0x17   :  { %p334_p10 = pnand %p332_p9, %p329_p8 }
  0x19   :  { %337 = shalt.err (!%p334_p10)
}
  0x1a   :  { %s338_s14 = scalar_lea.vmem %s32_s21, 128  ;;  %p343_p12 = scmp.lt.s32.totalorder %s32_s21, %s32_s21 }
  0x1b   :  { %p339_p11 = scmp.ne.s32.totalorder %s32_s21, %s338_s14  ;;  %p344_p13 = scmp.lt.s32.totalorder %s338_s14, %s338_s14 }
  0x1d   :  { %p345_p0 = por %p344_p13, %p343_p12 }
  0x1f   :  { %p346_p1 = pnand %p345_p0, %p339_p11 }
  0x21   :  { %349 = shalt.err (!%p346_p1)
}
  0x22   :  { %34 = dma.hbm_to_vmem [thread:$0]  %s500_s1, 128, %s32_s21, [#allocation6]  }
  0x23   :  { %394 = dma.done.wait [#allocation3], 128  }
  0x24   :  { %395 = vsyncadd [#allocation3], 4294967168 }
  0x25   :  { %396 = dma.done.wait [#allocation6], 128  }
  0x26   :  { %397 = vsyncadd [#allocation6], 4294967168  ;;  %v80_v0 = vlaneseq  ;;  %v404_v1 = vmov 0.0|0.0   ;;  %vm405_vm0 = vmmov 0   ;;  %v406_v4 = vmov 0.0   ;;  %v45_v9 = vld [vmem:[#allocation2] sm:$0xff] }
  0x27   :  { %285 = vmatprep.subr.bf16.mxu0 %v404_v1  ;;  %282 = vmatprep.mubr.msk.f32.mxu0 %vm405_vm0, %v406_v4  ;;  %vm505_vm1 = vcmask 261120   ;;  %v407_v15 = vmov 1.0|1.0   ;;  %v78_v16 = vld [vmem:[#allocation5] sm:$0xff]  ;;  %v248_v31 = vld [vmem:[%s501_s2] ss:$0 sm:$0xff] }
  0x28   :  { %v81_v2 = vshrl.u32 %v80_v0, 7  ;;  %v88_v3 = vand.u32 127, %v80_v0  ;;  %v47_v12 = vsel %vm505_vm1, %v45_v9, 0.0  ;;  %v79_v17 = vmul.f32 %v78_v16, %v78_v16  ;;  %v249_v33 = vld [vmem:[%s502_s3] ss:$0 sm:$0xff]  ;;  %s408_s19 = smov [#allocation7]  }
  0x29   :  { %48 = vadd.xlane.f32.xlu0 %v47_v12  ;;  %s224_s20 = sshll.u32 %s408_s19, 4  ;;  %s225_s20 = int_to_ptr.vmem [resolvable:$true] %s224_s20 }
  0x2a   :  { %v82_v5 = vadd.s32 8, %v81_v2  ;;  %v89_v6 = vmul.u32 3, %v88_v3  ;;  %v83_v10 = vadd.s32 16, %v81_v2  ;;  %v84_v11 = vadd.s32 24, %v81_v2  ;;  %s350_s21 = scalar_lea.vmem %s225_s20, 128  ;;  %p355_p3 = scmp.lt.s32.totalorder %s225_s20, %s225_s20 }
  0x2b   :  { %v85_v13 = vadd.s32 32, %v81_v2  ;;  %v86_v14 = vadd.s32 40, %v81_v2  ;;  %p351_p2 = scmp.ne.s32.totalorder %s225_s20, %s350_s21  ;;  %p356_p4 = scmp.lt.s32.totalorder %s350_s21, %s350_s21 }
  0x2c   :  { %vm90_vm2 = vcmp.eq.s32.totalorder %v81_v2, %v89_v6  ;;  %v96_v7 = vadd.s32 1, %v89_v6  ;;  %v109_v8 = vadd.s32 2, %v89_v6  ;;  %vm91_vm3 = vcmp.eq.s32.totalorder %v82_v5, %v89_v6 }
  0x2d   :  { %vm92_vm11 = vcmp.eq.s32.totalorder %v83_v10, %v89_v6  ;;  %vm93_vm14 = vcmp.eq.s32.totalorder %v84_v11, %v89_v6  ;;  %p357_p5 = por %p356_p4, %p355_p3 }
  0x2e   :  { %vm97_vm4 = vcmp.eq.s32.totalorder %v81_v2, %v96_v7  ;;  %vm98_vm5 = vcmp.eq.s32.totalorder %v82_v5, %v96_v7  ;;  %vm110_vm6 = vcmp.eq.s32.totalorder %v81_v2, %v109_v8  ;;  %vm111_vm8 = vcmp.eq.s32.totalorder %v82_v5, %v109_v8 }
  0x2f   :  { %vm103_vm7 = vmor %vm90_vm2, %vm97_vm4  ;;  %vm99_vm12 = vcmp.eq.s32.totalorder %v83_v10, %v96_v7  ;;  %vm100_vm15 = vcmp.eq.s32.totalorder %v84_v11, %v96_v7  ;;  %vm112_vm1 = vcmp.eq.s32.totalorder %v83_v10, %v109_v8  ;;  %vm113_vm4 = vcmp.eq.s32.totalorder %v84_v11, %v109_v8  ;;  %p358_p6 = pnand %p357_p5, %p351_p2 }
  0x30   :  { %vm104_vm9 = vmor %vm91_vm3, %vm98_vm5 }
  0x31   :  { %vm116_vm10 = vmor %vm103_vm7, %vm110_vm6  ;;  %vm94_vm6 = vcmp.eq.s32.totalorder %v85_v13, %v89_v6  ;;  %vm101_vm7 = vcmp.eq.s32.totalorder %v85_v13, %v96_v7 }
  0x32   :  { %vm117_vm13 = vmor %vm104_vm9, %vm111_vm8  ;;  %vm95_vm9 = vcmp.eq.s32.totalorder %v86_v14, %v89_v6 }
  0x33   :  { %vm286_vm0 = vmpackc.low %vm117_vm13, %vm116_vm10  ;;  %vm102_vm10 = vcmp.eq.s32.totalorder %v86_v14, %v96_v7 }
  0x34   :  { %287 = vmatpush3.bf16.msk.msra.mxu0 %vm286_vm0, %v407_v15  ;;  %vm105_vm2 = vmor %vm92_vm11, %vm99_vm12  ;;  %vm114_vm0 = vcmp.eq.s32.totalorder %v85_v13, %v109_v8  ;;  %vm115_vm12 = vcmp.eq.s32.totalorder %v86_v14, %v109_v8 }
  0x35   :  { %288 = vmatprep.subr.bf16.mxu0 %v404_v1  ;;  %vm106_vm3 = vmor %vm93_vm14, %vm100_vm15 }
  0x36   :  { %vm118_vm5 = vmor %vm105_vm2, %vm112_vm1 }
  0x37   :  { %vm119_vm8 = vmor %vm106_vm3, %vm113_vm4  ;;  %vm134_vm3 = vcmask 392192   ;;  %vm506_vm4 = vcmask 261120  }
  0x38   :  { %vm289_vm13 = vmpackc.low %vm119_vm8, %vm118_vm5  ;;  %vm209_vm5 = vcmask 130048  }
  0x39   :  { %290 = vmatpush3.bf16.msk.msra.mxu0 %vm289_vm13, %v407_v15  ;;  %vm107_vm11 = vmor %vm94_vm6, %vm101_vm7 }
  0x3a   :  { %291 = vmatprep.subr.bf16.mxu0 %v404_v1  ;;  %vm108_vm14 = vmor %vm95_vm9, %vm102_vm10 }
  0x3b   :  { %vm120_vm15 = vmor %vm107_vm11, %vm114_vm0 }
  0x3c   :  { %vm121_vm1 = vmor %vm108_vm14, %vm115_vm12 }
  0x3d   :  { %vm292_vm2 = vmpackc.low %vm121_vm1, %vm120_vm15 }
  0x3e   :  { %293 = vmatpush3.bf16.msk.msra.mxu0 %vm292_vm2, %v407_v15  ;;  %vm507_vm6 = vmmov %vm506_vm4 }
  0x41   :  { %283 = vmatmul.mubr.msk.f32.vlgmr.msra.gmra.mrb[0].mxu0 %vm134_vm3, %v79_v17 }
  0xb6   :  { %v49_v18 = vpop.xlane.xlu0 %48 }
  0xb7   :  { %v51_v19 = vmul.f32 0.03125, %v49_v18 }
  0xb9   :  { %v52_v20 = vsub.f32 %v45_v9, %v51_v19 }
  0xbb   :  { %v53_v21 = vmul.f32 %v52_v20, %v52_v20 }
  0xbd   :  { %v54_v22 = vsel %vm506_vm4, %v53_v21, 0.0 }
  0xbe   :  { %55 = vadd.xlane.f32.xlu0 %v54_v22 }
 0x114   :  { %v204_v23 = vpop.f32.mrb[0].mxu0 }
 0x115   :  { %v208_v24 = vmax.f32 %v204_v23, 1e-08  ;;  %v284_v25 = vpop.f32.mrb[1].mxu0 }
 0x117   :  { %v210_v26 = vsel %vm209_vm5, %v208_v24, 0.0 }
 0x118   :  { %211 = vadd.xlane.f32.xlu1 %v210_v26 }
 0x14b   :  { %v56_v27 = vpop.xlane.xlu0 %55 }
 0x14c   :  { %v57_v28 = vmul.f32 0.03125, %v56_v27 }
 0x14e   :  { %v58_v29 = vadd.f32 1e-05, %v57_v28 }
 0x150   :  { %302 = vrsqrt.f32 %v58_v29 }
 0x15a   :  { %v303_v30 = vpop.eup %302 }
 0x15b   :  { %v60_v32 = vmul.f32 %v303_v30, %v52_v20 }
 0x15d   :  { %v68_v34 = vmul.f32 %v248_v31, %v60_v32 }
 0x15f   :  { %v76_v35 = vadd.f32 %v249_v33, %v68_v34 }
 0x161   :  { %77 = vst.msk [vmem:[#allocation7] sm:$0xff] %vm507_vm6, %v76_v35 }
 0x162   :  { %361 = shalt.err (!%p358_p6)
}
 0x163   :  { %s362_s23 = scalar_lea.hbm %s503_s4, 128 }
 0x164   :  { %p363_p7 = scmp.ne.s32.totalorder %s503_s4, %s362_s23  ;;  %p366_p8 = scmp.lt.u32.totalorder %s362_s23, %s503_s4 }
 0x166   :  { %p368_p9 = pnand %p366_p8, %p363_p7 }
 0x168   :  { %371 = shalt.err (!%p368_p9)
}
 0x169   :  { %227 = dma.vmem_to_hbm [thread:$0]  %s225_s20, 128, %s503_s4, [#allocation4]  }
 0x16a   :  { %s409_s29 = smov [#allocation8]  }
 0x16b   :  { %s234_s30 = sshll.u32 %s409_s29, 4  ;;  %s235_s30 = int_to_ptr.vmem [resolvable:$true] %s234_s30 }
 0x16c   :  { %s372_s6 = scalar_lea.vmem %s235_s30, 128  ;;  %p377_p11 = scmp.lt.s32.totalorder %s235_s30, %s235_s30 }
 0x16d   :  { %p373_p10 = scmp.ne.s32.totalorder %s235_s30, %s372_s6  ;;  %p378_p12 = scmp.lt.s32.totalorder %s372_s6, %s372_s6 }
 0x16f   :  { %p379_p13 = por %p378_p12, %p377_p11 }
 0x171   :  { %p380_p0 = pnand %p379_p13, %p373_p10 }
 0x1a5   :  { %v212_v36 = vpop.xlane.xlu1 %211 }
 0x1a6   :  { %v214_v37 = vmul.f32 0.0625, %v212_v36 }
 0x1a8   :  { %304 = vrsqrt.f32 %v214_v37 }
 0x1b2   :  { %v305_v38 = vpop.eup %304 }
 0x1b3   :  { %v216_v39 = vmul.f32 %v305_v38, %v78_v16 }
 0x1b5   :  { %217 = vst.msk [vmem:[#allocation8] sm:$0xff] %vm134_vm3, %v216_v39 }
 0x1b6   :  { %383 = shalt.err (!%p380_p0)
}
 0x1b7   :  { %s384_s4 = scalar_lea.hbm %s504_s5, 128 }
 0x1b8   :  { %p385_p1 = scmp.ne.s32.totalorder %s504_s5, %s384_s4  ;;  %p388_p2 = scmp.lt.u32.totalorder %s384_s4, %s504_s5 }
 0x1ba   :  { %p390_p3 = pnand %p388_p2, %p385_p1 }
 0x1bc   :  { %393 = shalt.err (!%p390_p3)
}
 0x1bd   :  { %237 = dma.vmem_to_hbm [thread:$0]  %s235_s30, 128, %s504_s5, [#allocation9]  }
 0x1be   :  { %398 = dma.done.wait [#allocation4], 128  }
 0x1bf   :  { %399 = vsyncadd [#allocation4], 4294967168 }
 0x1c0   :  { %400 = dma.done.wait [#allocation9], 128  }
 0x1c1   :  { %401 = vsyncadd [#allocation9], 4294967168 }
 0x1c2   :  { %244 = vsyncpa [#allocation3], 1 }
 0x1c3   :  { %245 = vsyncpa [#allocation6], 1 }
 0x1c4   :  { %246 = vsyncpa [#allocation4], 1 }
 0x1c5   :  { %247 = vsyncpa [#allocation9], 1 }

</bundles_post_ra>
